<compile_context>
chip_gen: v7x
topology: tpu7x:2x2x1
jax: 0.10.0
libtpu: 0.0.40
codegen_flags: <defaults>
</compile_context>

<pallas_src>
import functools

import jax
import jax.numpy as jnp
from jax.experimental import pallas as pl
from jax.experimental.pallas import tpu as pltpu


# Lane-tile cap for the time axis (multiple of 128).
_T_TILE_CAP = 512
# Explicit scoped-VMEM request (fits every generation's physical VMEM).
_VMEM_LIMIT_BYTES = 32 * 1024 * 1024
# Arrays smaller than this fall back to plain XLA.  0 == always use the Pallas
# kernels so the demo below exercises them.
_PALLAS_MIN_ELEMENTS = 0


def _pick_t_tile(t):
    return t if t <= _T_TILE_CAP else _T_TILE_CAP


def _compiler_params():
    return pltpu.CompilerParams(
        dimension_semantics=("arbitrary",),   # time axis is a reduction axis
        vmem_limit_bytes=_VMEM_LIMIT_BYTES,
    )


# ----------------------------- Pallas kernels ------------------------------ #

def _flow_sums_kernel(*args, n_tensors):
    """Fused masked reductions for the flow loss.

    args = (lens_0, data_0, lens_1, data_1, ..., out)
      data_0   : z flattened to (B*C, t_tile)         -> accumulate z^2 (masked)
      data_k>0 : log_s_k flattened to (B*C_k, t_tile) -> accumulate log_s (masked)
      lens_q   : (rows_q, 1) int32 valid length per row
      out      : (n_tensors, t_tile) f32 per-lane partial sums, revisited
                 across the whole time grid (accumulator pattern).
    """
    out_ref = args[-1]
    t = pl.program_id(0)

    @pl.when(t == 0)
    def _init():
        out_ref[...] = jnp.zeros_like(out_ref)

    t_tile = out_ref.shape[-1]
    base = t * t_tile
    parts = []
    for q in range(n_tensors):
        lens_ref = args[2 * q]
        data_ref = args[2 * q + 1]
        rows = data_ref.shape[0]
        col = jax.lax.broadcasted_iota(jnp.int32, (rows, t_tile), 1) + base
        valid = col < lens_ref[...]                         # (rows, t_tile)
        v = data_ref[...].astype(jnp.float32)
        if q == 0:
            v = v * v                                       # z -> z * z
        parts.append(jnp.sum(jnp.where(valid, v, 0.0), axis=0, keepdims=True))
    out_ref[...] += jnp.concatenate(parts, axis=0)          # single full store


def _regression_sum_kernel(lens_ref, x_hat_ref, x_ref, out_ref, *, t_total,
                           use_bce):
    """Masked MSE / BCE-with-logits numerator, accumulated per lane."""
    t = pl.program_id(0)

    @pl.when(t == 0)
    def _init():
        out_ref[...] = jnp.zeros_like(out_ref)

    t_tile = out_ref.shape[-1]
    rows = x_ref.shape[0]
    base = t * t_tile
    col = jax.lax.broadcasted_iota(jnp.int32, (rows, t_tile), 1) + base
    valid = col < lens_ref[...]                             # (rows, t_tile)

    x_hat = x_hat_ref[...].astype(jnp.float32)
    x = x_ref[...].astype(jnp.float32)
    if use_bce:
        # Reference zeroes logits/targets with the mask *before* a sum-reduced
        # BCE, so masked (but in-bounds) positions each contribute log(2).
        xh = jnp.where(valid, x_hat, 0.0)
        xt = jnp.where(valid, x, 0.0)
        per = (jnp.maximum(xh, 0.0) - xh * xt
               + jnp.log1p(jnp.exp(-jnp.abs(xh))))
        in_bounds = col < t_total          # drop grid padding, keep masked cols
        per = jnp.where(in_bounds, per, 0.0)
    else:
        d = x_hat - x
        per = jnp.where(valid, d * d, 0.0)
    out_ref[...] += jnp.sum(per, axis=0, keepdims=True)


# ------------------------------ kernel drivers ------------------------------ #

def _flow_sums_pallas(lens_div, z, log_s_list):
    """Returns (1+K,) f32: [sum((z*m)^2), sum(log_s_0*m), ..., sum(log_s_{K-1}*m)]."""
    _, _, T = z.shape
    tensors = [z] + list(log_s_list)
    n_tensors = len(tensors)
    t_tile = _pick_t_tile(T)
    grid = (pl.cdiv(T, t_tile),)
    lens_i = lens_div.astype(jnp.int32)

    inputs, in_specs = [], []
    for a in tensors:
        rows = a.shape[0] * a.shape[1]
        inputs.append(jnp.repeat(lens_i, a.shape[1]).reshape(rows, 1))
        inputs.append(a.reshape(rows, T))
        in_specs.append(pl.BlockSpec((rows, 1), lambda t: (0, 0)))
        in_specs.append(pl.BlockSpec((rows, t_tile), lambda t: (0, t)))

    out = pl.pallas_call(
        functools.partial(_flow_sums_kernel, n_tensors=n_tensors),
        grid=grid,
        in_specs=in_specs,
        out_specs=pl.BlockSpec((n_tensors, t_tile), lambda t: (0, 0)),
        out_shape=jax.ShapeDtypeStruct((n_tensors, t_tile), jnp.float32),
        compiler_params=_compiler_params(),
    )(*inputs)
    # tiny epilogue reduction in XLA
    return jnp.sum(out, axis=1)


def _regression_sum_pallas(lens_div, x_hat, x, use_bce):
    B, C, T = x.shape
    rows = B * C
    t_tile = _pick_t_tile(T)
    grid = (pl.cdiv(T, t_tile),)
    lens_rows = jnp.repeat(lens_div.astype(jnp.int32), C).reshape(rows, 1)

    out = pl.pallas_call(
        functools.partial(_regression_sum_kernel, t_total=T, use_bce=use_bce),
        grid=grid,
        in_specs=[pl.BlockSpec((rows, 1), lambda t: (0, 0)),
                  pl.BlockSpec((rows, t_tile), lambda t: (0, t)),
                  pl.BlockSpec((rows, t_tile), lambda t: (0, t))],
        out_specs=pl.BlockSpec((1, t_tile), lambda t: (0, 0)),
        out_shape=jax.ShapeDtypeStruct((1, t_tile), jnp.float32),
        compiler_params=_compiler_params(),
    )(lens_rows, x_hat.reshape(rows, T), x.reshape(rows, T))
    return jnp.sum(out)


# ------------------------- plain-jnp reference path ------------------------- #
# Used (a) as the fallback for microscopic tensors and (b) for self-checking.

def get_mask_from_lengths(lens, max_len):
    ids = jnp.arange(max_len, dtype=lens.dtype)
    return ids[None, :] < lens[:, None]


def _flow_sums_ref(lens_div, z, log_s_list):
    m = get_mask_from_lengths(lens_div, z.shape[-1]).astype(jnp.float32)[:, None, :]
    zm = z * m
    parts = [jnp.sum(zm * zm)]
    for ls in log_s_list:
        parts.append(jnp.sum(ls * m))
    return jnp.stack(parts)


def _regression_sum_ref(lens_div, x_hat, x, use_bce):
    m = get_mask_from_lengths(lens_div, x.shape[-1]).astype(jnp.float32)[:, None, :]
    xh = x_hat * m
    xt = x * m
    if use_bce:
        return jnp.sum(jnp.maximum(xh, 0.0) - xh * xt
                       + jnp.log1p(jnp.exp(-jnp.abs(xh))))
    return jnp.sum((xh - xt) ** 2)


# ------------------------------ loss functions ----------------------------- #

def compute_flow_loss(z, log_det_W_list, log_s_list, n_elements, n_dims,
                      lens_div, sigma=1.0):
    if z.size >= _PALLAS_MIN_ELEMENTS:
        sums = _flow_sums_pallas(lens_div, z, log_s_list)
    else:
        sums = _flow_sums_ref(lens_div, z, log_s_list)
    prior_NLL = sums[0] / (2.0 * sigma * sigma)
    log_s_total = jnp.sum(sums[1:]) if len(log_s_list) else jnp.float32(0.0)
    log_det_W_total = jnp.float32(0.0)
    for w in log_det_W_list:
        log_det_W_total = log_det_W_total + w
    if len(log_det_W_list):
        log_det_W_total = log_det_W_total * n_elements
    denom = n_elements * n_dims
    loss = (prior_NLL - log_s_total - log_det_W_total) / denom
    loss_prior = prior_NLL / denom
    return loss, loss_prior


def compute_regression_loss(x_hat, x, lens_div, name=False):
    x = x[:, None, :] if x.ndim == 2 else x
    x_hat = x_hat[:, None, :] if x_hat.ndim == 2 else x_hat
    assert x.ndim == x_hat.ndim == 3
    T = x.shape[-1]
    lens_i = lens_div.astype(jnp.int32)
    use_bce = (name == 'vpred')
    if x.size >= _PALLAS_MIN_ELEMENTS:
        num = _regression_sum_pallas(lens_i, x_hat, x, use_bce)
    else:
        num = _regression_sum_ref(lens_i, x_hat, x, use_bce)
    # denominator == mask.sum() of the reference's (B, 1, T) float mask
    denom = jnp.sum(jnp.clip(lens_i, 0, T)).astype(jnp.float32)
    loss = num / denom
    return {'loss_{}'.format(name): loss}


# ------------------------------ module wrapper ----------------------------- #

class AttributePredictionLoss:
    def __init__(self, name, model_config, loss_weight, sigma=1.0):
        self.name = name
        self.sigma = sigma
        self.model_name = model_config['name']
        self.loss_weight = loss_weight
        self.n_group_size = 1
        if 'n_group_size' in model_config['hparams']:
            self.n_group_size = model_config['hparams']['n_group_size']

    def __call__(self, model_output, lens):
        lens = jnp.asarray(lens).astype(jnp.int32)
        lens_div = lens // self.n_group_size
        loss_dict = {}
        if 'z' in model_output:
            n_elements = (jnp.sum(lens) // self.n_group_size).astype(jnp.float32)
            n_dims = model_output['z'].shape[1]
            loss, loss_prior = compute_flow_loss(
                model_output['z'], model_output['log_det_W_list'],
                model_output['log_s_list'], n_elements, n_dims, lens_div,
                self.sigma)
            loss_dict = {
                'loss_{}'.format(self.name): (loss, self.loss_weight),
                'loss_prior_{}'.format(self.name): (loss_prior, 0.0),
            }
        elif 'x_hat' in model_output:
            loss_dict = compute_regression_loss(
                model_output['x_hat'], model_output['x'], lens_div, self.name)
            for k, v in loss_dict.items():
                loss_dict[k] = (v, self.loss_weight)
        if len(loss_dict) == 0:
            raise Exception('loss not supported')
        return loss_dict


# ----------------------------------- main ----------------------------------- #

if __name__ == "__main__":
    key = jax.random.PRNGKey(0)
    B, C, T = 2, 4, 16

    k1, k2, k3, k4, k5, k6 = jax.random.split(key, 6)

    # ---- flow-loss branch ('z' in model_output) ----
    z = jax.random.normal(k1, (B, C, T), dtype=jnp.float32)
    log_s_list = [
        jax.random.normal(k2, (B, C // 2, T), dtype=jnp.float32) * 0.1,
        jax.random.normal(k3, (B, C // 2, T), dtype=jnp.float32) * 0.1,
    ]
    log_det_W_list = [jnp.float32(0.25), jnp.float32(-0.1)]
    lens = jnp.array([16, 12], dtype=jnp.int32)

    flow_cfg = {'name': 'f0_flow', 'hparams': {'n_group_size': 1}}
    flow_loss_mod = AttributePredictionLoss('f0', flow_cfg, loss_weight=1.0)
    flow_out = flow_loss_mod(
        {'z': z, 'log_det_W_list': log_det_W_list, 'log_s_list': log_s_list},
        lens)

    # ---- regression branch (MSE) ----
    x_hat = jax.random.normal(k4, (B, 1, T), dtype=jnp.float32)
    x = jax.random.normal(k5, (B, 1, T), dtype=jnp.float32)
    reg_cfg = {'name': 'energy_regression', 'hparams': {}}
    reg_loss_mod = AttributePredictionLoss('energy', reg_cfg, loss_weight=1.0)
    reg_out = reg_loss_mod({'x_hat': x_hat, 'x': x}, lens)

    # ---- regression branch (BCE-with-logits, name == 'vpred') ----
    v_hat = jax.random.normal(k6, (B, 1, T), dtype=jnp.float32)
    v = (v_hat > 0).astype(jnp.float32)
    vpred_cfg = {'name': 'vpred_regression', 'hparams': {}}
    vpred_loss_mod = AttributePredictionLoss('vpred', vpred_cfg, loss_weight=1.0)
    vpred_out = vpred_loss_mod({'x_hat': v_hat, 'x': v}, lens)

    results = [flow_out['loss_f0'][0], flow_out['loss_prior_f0'][0],
               reg_out['loss_energy'][0], vpred_out['loss_vpred'][0]]
    for r in results:
        jax.block_until_ready(r)

    # ---- pure-jnp reference self-check (mirrors the PyTorch module) ----
    lens_div = lens // 1
    n_elements = (jnp.sum(lens) // 1).astype(jnp.float32)
    flow_sums = _flow_sums_ref(lens_div, z, log_s_list)
    prior = flow_sums[0] / 2.0
    log_s_total = jnp.sum(flow_sums[1:])
    ldw_total = (log_det_W_list[0] + log_det_W_list[1]) * n_elements
    denom = n_elements * C
    mask_sum = jnp.sum(jnp.clip(lens_div, 0, T)).astype(jnp.float32)
    ref_vals = [
        (prior - log_s_total - ldw_total) / denom,
        prior / denom,
        _regression_sum_ref(lens_div, x_hat, x, False) / mask_sum,
        _regression_sum_ref(lens_div, v_hat, v, True) / mask_sum,
    ]
    for got, want in zip(results, ref_vals):
        got_f, want_f = float(got), float(want)
        assert abs(got_f - want_f) <= 1e-3 * (1.0 + abs(want_f)), (got_f, want_f)

    print("KERNEL_OK")
</pallas_src>

<mosaic_0001>
module attributes {stable_mosaic.version = 11 : i64} {
  func.func @_flow_sums_kernel(%arg0: i32, %arg1: memref<8x1xi32, #tpu.memory_space<vmem>>, %arg2: memref<8x16xf32, #tpu.memory_space<vmem>>, %arg3: memref<4x1xi32, #tpu.memory_space<vmem>>, %arg4: memref<4x16xf32, #tpu.memory_space<vmem>>, %arg5: memref<4x1xi32, #tpu.memory_space<vmem>>, %arg6: memref<4x16xf32, #tpu.memory_space<vmem>>, %arg7: memref<3x16xf32, #tpu.memory_space<vmem>>) attributes {dimension_semantics = [#tpu.dimension_semantics<arbitrary>], iteration_bounds = array<i64: 1>, scalar_prefetch = 0 : i64, scratch_operands = 0 : i64, tpu.core_type = #tpu.core_type<tc>, window_params = [{pipeline_mode = #tpu.pipeline_mode<synchronous>, transform_indices = @transform_0, window_bounds = array<i64: 8, 1>}, {transform_indices = @transform_1, window_bounds = array<i64: 8, 16>}, {pipeline_mode = #tpu.pipeline_mode<synchronous>, transform_indices = @transform_2, window_bounds = array<i64: 4, 1>}, {transform_indices = @transform_3, window_bounds = array<i64: 4, 16>}, {pipeline_mode = #tpu.pipeline_mode<synchronous>, transform_indices = @transform_4, window_bounds = array<i64: 4, 1>}, {transform_indices = @transform_5, window_bounds = array<i64: 4, 16>}, {pipeline_mode = #tpu.pipeline_mode<synchronous>, transform_indices = @transform_6, window_bounds = array<i64: 3, 16>}]} {
    %c0_i32 = arith.constant 0 : i32
    %0 = arith.cmpi eq, %arg0, %c0_i32 : i32
    %1 = arith.extui %0 : i1 to i32
    %c0_i32_0 = arith.constant 0 : i32
    %2 = arith.cmpi ne, %1, %c0_i32_0 : i32
    scf.if %2 {
      %cst_21 = arith.constant 0.000000e+00 : f32
      %42 = vector.broadcast %cst_21 : f32 to vector<3x16xf32>
      %c0_22 = arith.constant 0 : index
      %c0_23 = arith.constant 0 : index
      %43 = vector.load %arg7[%c0_22, %c0_23] : memref<3x16xf32, #tpu.memory_space<vmem>>, vector<3x16xf32>
      tpu.vector_store %arg7[%c0_22, %c0_23], %42 {strides = array<i32>} : memref<3x16xf32, #tpu.memory_space<vmem>>, vector<3x16xf32>,
    } else {
    }
    %c16_i32 = arith.constant 16 : i32
    %3 = arith.muli %arg0, %c16_i32 : i32
    %4 = tpu.iota {dimensions = array<i32: 1>} : vector<8x16xi32>
    %5 = vector.broadcast %3 : i32 to vector<8x16xi32>
    %6 = arith.addi %4, %5 : vector<8x16xi32>
    %c0 = arith.constant 0 : index
    %c0_1 = arith.constant 0 : index
    %7 = vector.load %arg1[%c0, %c0_1] : memref<8x1xi32, #tpu.memory_space<vmem>>, vector<8x1xi32>
    %8 = vector.broadcast %7 : vector<8x1xi32> to vector<8x16xi32>
    %9 = arith.cmpi slt, %6, %8 : vector<8x16xi32>
    %c0_2 = arith.constant 0 : index
    %c0_3 = arith.constant 0 : index
    %10 = vector.load %arg2[%c0_2, %c0_3] : memref<8x16xf32, #tpu.memory_space<vmem>>, vector<8x16xf32>
    %11 = arith.mulf %10, %10 : vector<8x16xf32>
    %cst = arith.constant 0.000000e+00 : f32
    %12 = vector.broadcast %cst : f32 to vector<8x16xf32>
    %13 = arith.select %9, %11, %12 : vector<8x16xi1>, vector<8x16xf32>
    %cst_4 = arith.constant dense<0.000000e+00> : vector<16xf32>
    %14 = vector.multi_reduction <add>, %13, %cst_4 [0] : vector<8x16xf32> to vector<16xf32>
    %15 = vector.shape_cast %14 : vector<16xf32> to vector<1x16xf32>
    %16 = tpu.iota {dimensions = array<i32: 1>} : vector<4x16xi32>
    %17 = vector.broadcast %3 : i32 to vector<4x16xi32>
    %18 = arith.addi %16, %17 : vector<4x16xi32>
    %c0_5 = arith.constant 0 : index
    %c0_6 = arith.constant 0 : index
    %19 = vector.load %arg3[%c0_5, %c0_6] : memref<4x1xi32, #tpu.memory_space<vmem>>, vector<4x1xi32>
    %20 = vector.broadcast %19 : vector<4x1xi32> to vector<4x16xi32>
    %21 = arith.cmpi slt, %18, %20 : vector<4x16xi32>
    %c0_7 = arith.constant 0 : index
    %c0_8 = arith.constant 0 : index
    %22 = vector.load %arg4[%c0_7, %c0_8] : memref<4x16xf32, #tpu.memory_space<vmem>>, vector<4x16xf32>
    %cst_9 = arith.constant 0.000000e+00 : f32
    %23 = vector.broadcast %cst_9 : f32 to vector<4x16xf32>
    %24 = arith.select %21, %22, %23 : vector<4x16xi1>, vector<4x16xf32>
    %cst_10 = arith.constant dense<0.000000e+00> : vector<16xf32>
    %25 = vector.multi_reduction <add>, %24, %cst_10 [0] : vector<4x16xf32> to vector<16xf32>
    %26 = vector.shape_cast %25 : vector<16xf32> to vector<1x16xf32>
    %27 = tpu.iota {dimensions = array<i32: 1>} : vector<4x16xi32>
    %28 = vector.broadcast %3 : i32 to vector<4x16xi32>
    %29 = arith.addi %27, %28 : vector<4x16xi32>
    %c0_11 = arith.constant 0 : index
    %c0_12 = arith.constant 0 : index
    %30 = vector.load %arg5[%c0_11, %c0_12] : memref<4x1xi32, #tpu.memory_space<vmem>>, vector<4x1xi32>
    %31 = vector.broadcast %30 : vector<4x1xi32> to vector<4x16xi32>
    %32 = arith.cmpi slt, %29, %31 : vector<4x16xi32>
    %c0_13 = arith.constant 0 : index
    %c0_14 = arith.constant 0 : index
    %33 = vector.load %arg6[%c0_13, %c0_14] : memref<4x16xf32, #tpu.memory_space<vmem>>, vector<4x16xf32>
    %cst_15 = arith.constant 0.000000e+00 : f32
    %34 = vector.broadcast %cst_15 : f32 to vector<4x16xf32>
    %35 = arith.select %32, %33, %34 : vector<4x16xi1>, vector<4x16xf32>
    %cst_16 = arith.constant dense<0.000000e+00> : vector<16xf32>
    %36 = vector.multi_reduction <add>, %35, %cst_16 [0] : vector<4x16xf32> to vector<16xf32>
    %37 = vector.shape_cast %36 : vector<16xf32> to vector<1x16xf32>
    %c0_17 = arith.constant 0 : index
    %c0_18 = arith.constant 0 : index
    %38 = vector.load %arg7[%c0_17, %c0_18] : memref<3x16xf32, #tpu.memory_space<vmem>>, vector<3x16xf32>
    %39 = tpu.concatenate %15, %26, %37 in 0 : vector<1x16xf32>, vector<1x16xf32>, vector<1x16xf32> -> vector<3x16xf32>
    %40 = arith.addf %38, %39 : vector<3x16xf32>
    %c0_19 = arith.constant 0 : index
    %c0_20 = arith.constant 0 : index
    %41 = vector.load %arg7[%c0_19, %c0_20] : memref<3x16xf32, #tpu.memory_space<vmem>>, vector<3x16xf32>
    tpu.vector_store %arg7[%c0_19, %c0_20], %40 {strides = array<i32>} : memref<3x16xf32, #tpu.memory_space<vmem>>, vector<3x16xf32>,
    return
  }
  func.func @transform_0(%arg0: i32) -> (i32, i32) {
    %c0_i32 = arith.constant 0 : i32
    %c0_i32_0 = arith.constant 0 : i32
    %c0_i32_1 = arith.constant 0 : i32
    return %c0_i32, %c0_i32_0 : i32, i32
  }
  func.func @transform_1(%arg0: i32) -> (i32, i32) {
    %c0_i32 = arith.constant 0 : i32
    %c0_i32_0 = arith.constant 0 : i32
    return %c0_i32, %arg0 : i32, i32
  }
  func.func @transform_2(%arg0: i32) -> (i32, i32) {
    %c0_i32 = arith.constant 0 : i32
    %c0_i32_0 = arith.constant 0 : i32
    %c0_i32_1 = arith.constant 0 : i32
    return %c0_i32, %c0_i32_0 : i32, i32
  }
  func.func @transform_3(%arg0: i32) -> (i32, i32) {
    %c0_i32 = arith.constant 0 : i32
    %c0_i32_0 = arith.constant 0 : i32
    return %c0_i32, %arg0 : i32, i32
  }
  func.func @transform_4(%arg0: i32) -> (i32, i32) {
    %c0_i32 = arith.constant 0 : i32
    %c0_i32_0 = arith.constant 0 : i32
    %c0_i32_1 = arith.constant 0 : i32
    return %c0_i32, %c0_i32_0 : i32, i32
  }
  func.func @transform_5(%arg0: i32) -> (i32, i32) {
    %c0_i32 = arith.constant 0 : i32
    %c0_i32_0 = arith.constant 0 : i32
    return %c0_i32, %arg0 : i32, i32
  }
  func.func @transform_6(%arg0: i32) -> (i32, i32) {
    %c0_i32 = arith.constant 0 : i32
    %c0_i32_0 = arith.constant 0 : i32
    %c0_i32_1 = arith.constant 0 : i32
    return %c0_i32, %c0_i32_0 : i32, i32
  }
}

</mosaic_0001>

<bundles_post_ra>
// kernel: tpu_custom_call.1
= control target key start
LH: loop header
LB: loop body
LE: loop exit
PB: predicated region body
PF: predicated region fallthrough
CT: control target
= control target key end

     0   :  { %v131_v2 = vmov 0   ;;  %s203_s0 = inlined_call_operand.vmem [shape: s32[8,1], index: 0, kind: input, shape index: {}]   ;;  %s204_s1 = inlined_call_operand.vmem [shape: f32[8,16], index: 1, kind: input, shape index: {}]   ;;  %s205_s2 = inlined_call_operand.vmem [shape: s32[4,1], index: 2, kind: input, shape index: {}]   ;;  %s206_s3 = inlined_call_operand.vmem [shape: f32[4,16], index: 3, kind: input, shape index: {}]   ;;  %s207_s4 = inlined_call_operand.vmem [shape: s32[4,1], index: 4, kind: input, shape index: {}]   ;;  %s208_s5 = inlined_call_operand.vmem [shape: f32[4,16], index: 5, kind: input, shape index: {}]   ;;  %s209_s6 = inlined_call_operand.hbm [shape: f32[3,16], index: 6, kind: output, shape index: {}]  }
   0x1   :  { %v66_v0 = vld [vmem:[%s207_s4] sm:$0xf]  ;;  %106 = vset.pattern.permute.xlu1 %v131_v2  ;;  %105 = vset.pattern.permute.xlu0 %v131_v2 }
   0x2   :  { %v35_v1 = vld [vmem:[%s203_s0] sm:$0xff] }
   0x3   :  { %11 = vsyncpa [#allocation3], 0  ;;  %68 = vperm.xlu1 %106, %v66_v0   ;;  %37 = vperm.xlu0 %105, %v35_v1   ;;  %v51_v3 = vld [vmem:[%s205_s2] sm:$0xf]  ;;  %vm28_vm0 = vcmask 124928   ;;  %v132_v4 = vmov 0.0   ;;  %v31_v5 = vlaneseq }
   0x4   :  { %29 = vst.msk [vmem:[#allocation2] sm:$0x7] %vm28_vm0, %v132_v4  ;;  %v40_v6 = vld [vmem:[%s204_s1] sm:$0xff]  ;;  %vm58_vm1 = vcmask 125952   ;;  %vm43_vm2 = vcmask 130048   ;;  %vm81_vm6 = vcmask 1040384  }
   0x5   :  { %v32_v7 = vand.u32 127, %v31_v5  ;;  %v41_v8 = vmul.f32 %v40_v6, %v40_v6  ;;  %v71_v9 = vld [vmem:[%s208_s5] sm:$0xf]  ;;  %vm83_vm7 = vcmask 1041408   ;;  %s133_s1 = smov [#allocation2]  }
   0x6   :  { %v56_v16 = vld [vmem:[%s206_s3] sm:$0xf]  ;;  %s94_s3 = sshll.u32 %s133_s1, 4  ;;  %s95_s3 = int_to_ptr.vmem [resolvable:$true] %s94_s3 }
   0x7   :  { %53 = vperm.xlu0 %105, %v51_v3   ;;  %s107_s5 = scalar_lea.vmem %s95_s3, 64  ;;  %p112_p1 = scmp.lt.s32.totalorder %s95_s3, %s95_s3 }
   0x8   :  { %p108_p0 = scmp.ne.s32.totalorder %s95_s3, %s107_s5  ;;  %p113_p2 = scmp.lt.s32.totalorder %s107_s5, %s107_s5 }
   0xa   :  { %p114_p3 = por %p113_p2, %p112_p1 }
   0xb   :  { %v80_v38 = vld [vmem:[#allocation2] sm:$0x7] }
   0xc   :  { %p115_p4 = pnand %p114_p3, %p108_p0 }
  0x82   :  { %v69_v10 = vpop.permute.xlu1 %68  ;;  %v38_v11 = vpop.permute.xlu0 %37 }
  0x83   :  { %vm70_vm3 = vcmp.lt.s32.totalorder %v32_v7, %v69_v10  ;;  %vm39_vm4 = vcmp.lt.s32.totalorder %v32_v7, %v38_v11 }
  0x84   :  { %v72_v12 = vsel %vm70_vm3, %v71_v9, 0.0  ;;  %v42_v13 = vsel %vm39_vm4, %v41_v8, 0.0 }
  0x85   :  { %v73_v14 = vsel %vm58_vm1, %v72_v12, 0.0  ;;  %v44_v15 = vsel %vm43_vm2, %v42_v13, 0.0 }
  0x86   :  { %v74_v17 = vrot.slane %v73_v14, 4  ;;  %v45_v18 = vrot.slane %v44_v15, 4  ;;  %v54_v19 = vpop.permute.xlu0 %53 }
  0x87   :  { %vm55_vm5 = vcmp.lt.s32.totalorder %v32_v7, %v54_v19 }
  0x88   :  { %v75_v20 = vadd.f32 %v74_v17, %v73_v14  ;;  %v46_v21 = vadd.f32 %v45_v18, %v44_v15  ;;  %v57_v22 = vsel %vm55_vm5, %v56_v16, 0.0 }
  0x89   :  { %v59_v23 = vsel %vm58_vm1, %v57_v22, 0.0 }
  0x8a   :  { %v76_v24 = vrot.slane %v75_v20, 2  ;;  %v47_v25 = vrot.slane %v46_v21, 2  ;;  %v60_v26 = vrot.slane %v59_v23, 4 }
  0x8c   :  { %v48_v27 = vadd.f32 %v47_v25, %v46_v21  ;;  %v61_v28 = vadd.f32 %v60_v26, %v59_v23  ;;  %v77_v29 = vadd.f32 %v76_v24, %v75_v20 }
  0x8e   :  { %v62_v30 = vrot.slane %v61_v28, 2  ;;  %v49_v31 = vrot.slane %v48_v27, 1  ;;  %v78_v33 = vrot.slane %v77_v29, 1 }
  0x90   :  { %v63_v32 = vadd.f32 %v62_v30, %v61_v28  ;;  %v50_v35 = vadd.f32 %v49_v31, %v48_v27  ;;  %v79_v37 = vadd.f32 %v78_v33, %v77_v29 }
  0x92   :  { %v64_v34 = vrot.slane %v63_v32, 1 }
  0x94   :  { %v65_v36 = vadd.f32 %v64_v34, %v63_v32 }
  0x96   :  { %v82_v39 = vsel %vm81_vm6, %v50_v35, %v65_v36 }
  0x97   :  { %v84_v40 = vsel %vm83_vm7, %v82_v39, %v79_v37 }
  0x98   :  { %v85_v41 = vadd.f32 %v84_v40, %v80_v38 }
  0x9a   :  { %87 = vst.msk [vmem:[#allocation2] sm:$0x7] %vm28_vm0, %v85_v41 }
  0x9b   :  { %118 = shalt.err (!%p115_p4)
}
  0x9c   :  { %s119_s8 = scalar_lea.hbm %s209_s6, 64 }
  0x9d   :  { %p120_p5 = scmp.ne.s32.totalorder %s209_s6, %s119_s8  ;;  %p123_p6 = scmp.lt.u32.totalorder %s119_s8, %s209_s6 }
  0x9f   :  { %p125_p7 = pnand %p123_p6, %p120_p5 }
  0xa1   :  { %128 = shalt.err (!%p125_p7)
}
  0xa2   :  { %97 = dma.vmem_to_hbm [thread:$0]  %s95_s3, 64, %s209_s6, [#allocation3]  }
  0xa3   :  { %129 = dma.done.wait [#allocation3], 64  }
  0xa4   :  { %130 = vsyncadd [#allocation3], 4294967232 }
  0xa5   :  { %101 = vsyncpa [#allocation3], 1 }

</bundles_post_ra>
